<compile_context>
chip_gen: v7x
topology: tpu7x:2x2x1
jax: 0.10.0
libtpu: 0.0.40
codegen_flags: <defaults>
</compile_context>

<pallas_src>
import jax
import jax.numpy as jnp
from jax.experimental import pallas as pl
from jax.experimental.pallas import tpu as pltpu


def _make_kernel(n_batch, c_in, k_taps, k_pad, row_stride, l_out):
    """Builds the kernel closure (all shapes/shifts are static Python ints)."""
    # Tap ordering t = (dy*3 + dx)*Cin + c  (must match the wrapper's weight layout).
    shifts = [dy * row_stride + dx for dy in range(3) for dx in range(3)]
    n_zero = k_pad - k_taps

    def kernel(xf_ref, w_ref, o_ref):
        # xf_ref: (N, Cin, Lsrc_pad) bf16 flattened zero-padded images (row stride W+2)
        # w_ref : (Cout, K_pad)      bf16 conv weight, tap-major, K zero-padded
        # o_ref : (N, Cout, L_out)   f32 "wide" output (lane-dense, multiple of 128)
        w = w_ref[...]                       # hoisted; (Cout, K_pad) bf16
        x_all = xf_ref[...]                  # ONE aligned load of the whole input block

        # Register-assembled im2col patch matrix (K_pad, N*L_out) bf16.
        tap_rows = []
        for sh in shifts:                    # static shifts: 0,1,2,S,S+1,S+2,2S,2S+1,2S+2
            blocks = [x_all[n, :, sh:sh + l_out] for n in range(n_batch)]  # (Cin, L_out)
            tap_rows.append(blocks[0] if n_batch == 1
                            else jnp.concatenate(blocks, axis=1))          # (Cin, N*L)
        if n_zero:
            # K-padding rows kept explicitly zero (matches zero weight columns; never
            # reads uninitialized memory).
            tap_rows.append(jnp.zeros((n_zero, n_batch * l_out), jnp.bfloat16))
        patch = jnp.concatenate(tap_rows, axis=0)        # (K_pad, N*L_out) bf16

        # One fused MXU matmul for the whole batch, f32 accumulation.
        out_all = jnp.dot(w, patch, preferred_element_type=jnp.float32)   # (Cout, N*L)

        # Lane-aligned (L_out is a multiple of 128) unmasked full-block stores.
        for n in range(n_batch):
            o_ref[n, :, :] = out_all[:, n * l_out:(n + 1) * l_out].astype(o_ref.dtype)

    return kernel


@jax.jit
def overlap_patch_embed(x_nchw, weight_oihw):
    """x_nchw: (N, Cin, H, W) float32; weight_oihw: (Cout, Cin, 3, 3). Returns NCHW."""
    N, Cin, H, W = x_nchw.shape
    Cout = weight_oihw.shape[0]
    KH = KW = 3
    K = Cin * KH * KW                          # 27
    K_pad = ((K + 7) // 8) * 8                 # 32: padded contraction depth

    S = W + 2                                  # padded row stride of the wide layout
    L_out = ((H * S + 127) // 128) * 128       # lane-dense output length per image
    max_shift = (KH - 1) * S + (KW - 1)        # largest tap shift
    Lsrc = ((L_out + max_shift + 127) // 128) * 128   # vreg-aligned flattened source

    # Wrapper glue kept minimal: bf16 cast (halves DMA), one conv zero-pad, free reshape,
    # one alignment tail-pad.  No transposes.
    x_pad = jnp.pad(x_nchw.astype(jnp.bfloat16),
                    ((0, 0), (0, 0), (1, 1), (1, 1)))            # (N, Cin, H+2, W+2)
    x_flat = x_pad.reshape(N, Cin, (H + 2) * S)
    x_flat = jnp.pad(x_flat, ((0, 0), (0, 0), (0, Lsrc - (H + 2) * S)))   # (N, Cin, Lsrc)

    # Weight: (Cout, Cin, 3, 3) -> tap-major (Cout, 3, 3, Cin) -> (Cout, 27) -> pad to 32.
    w_mat = jnp.transpose(weight_oihw, (0, 2, 3, 1)).reshape(Cout, K).astype(jnp.bfloat16)
    w_mat = jnp.pad(w_mat, ((0, 0), (0, K_pad - K)))             # (Cout, K_pad)

    kernel = _make_kernel(N, Cin, K, K_pad, S, L_out)

    out_wide = pl.pallas_call(
        kernel,
        out_shape=jax.ShapeDtypeStruct((N, Cout, L_out), x_nchw.dtype),
        grid_spec=pltpu.PrefetchScalarGridSpec(
            num_scalar_prefetch=0,
            grid=(1,),  # single invocation: whole (toy-sized) problem in one block
            in_specs=[
                pl.BlockSpec((N, Cin, Lsrc), lambda i: (0, 0, 0)),
                pl.BlockSpec((Cout, K_pad), lambda i: (0, 0)),
            ],
            out_specs=pl.BlockSpec((N, Cout, L_out), lambda i: (0, 0, 0)),
        ),
        compiler_params=pltpu.CompilerParams(
            dimension_semantics=("arbitrary",)),
    )(x_flat, w_mat)

    # Wide (row stride W+2) -> NCHW: drop junk tail, split rows (free reshape), drop the
    # 2 pad columns per row.  Cheap row-crop, no transpose.
    out = out_wide[:, :, :H * S].reshape(N, Cout, H, S)[:, :, :, :W]
    return out


if __name__ == "__main__":
    # Shapes consistent with the module: in_c=3, embed_dim=48, bias=False.
    N, Cin, H, W = 2, 3, 16, 16
    Cout = 48

    key = jax.random.PRNGKey(0)
    kx, kw = jax.random.split(key)
    x = jax.random.normal(kx, (N, Cin, H, W), dtype=jnp.float32)
    w = jax.random.normal(kw, (Cout, Cin, 3, 3), dtype=jnp.float32) * 0.1

    out = jax.block_until_ready(overlap_patch_embed(x, w))

    # Reference: the same bf16-rounded operands the kernel feeds the MXU, f32 accumulation.
    xr = x.astype(jnp.bfloat16).astype(jnp.float32)
    wr = w.astype(jnp.bfloat16).astype(jnp.float32)
    ref = jax.lax.conv_general_dilated(
        xr, wr, window_strides=(1, 1), padding=((1, 1), (1, 1)),
        dimension_numbers=("NCHW", "OIHW", "NCHW"),
        precision=jax.lax.Precision.HIGHEST)

    assert out.shape == (N, Cout, H, W), out.shape
    max_err = float(jnp.max(jnp.abs(out - ref)))
    assert jnp.allclose(out, ref, atol=1e-3, rtol=1e-3), max_err

    print("KERNEL_OK")
</pallas_src>

<mosaic_0001>
module attributes {stable_mosaic.version = 11 : i64} {
  func.func @kernel(%arg0: i32, %arg1: memref<2x3x512xbf16, #tpu.memory_space<vmem>>, %arg2: memref<48x32xbf16, #tpu.memory_space<vmem>>, %arg3: memref<2x48x384xf32, #tpu.memory_space<vmem>>) attributes {dimension_semantics = [#tpu.dimension_semantics<arbitrary>], iteration_bounds = array<i64: 1>, scalar_prefetch = 0 : i64, scratch_operands = 0 : i64, tpu.core_type = #tpu.core_type<tc>, window_params = [{pipeline_mode = #tpu.pipeline_mode<synchronous>, transform_indices = @transform_0, window_bounds = array<i64: 2, 3, 512>}, {pipeline_mode = #tpu.pipeline_mode<synchronous>, transform_indices = @transform_1, window_bounds = array<i64: 48, 32>}, {pipeline_mode = #tpu.pipeline_mode<synchronous>, transform_indices = @transform_2, window_bounds = array<i64: 2, 48, 384>}]} {
    %c0 = arith.constant 0 : index
    %c0_0 = arith.constant 0 : index
    %0 = vector.load %arg2[%c0, %c0_0] : memref<48x32xbf16, #tpu.memory_space<vmem>>, vector<48x32xbf16>
    %c0_1 = arith.constant 0 : index
    %c0_2 = arith.constant 0 : index
    %c0_3 = arith.constant 0 : index
    %1 = vector.load %arg1[%c0_1, %c0_2, %c0_3] : memref<2x3x512xbf16, #tpu.memory_space<vmem>>, vector<2x3x512xbf16>
    %2 = vector.extract_strided_slice %1 {offsets = [0, 0, 0], sizes = [1, 3, 384], strides = [1, 1, 1]} : vector<2x3x512xbf16> to vector<1x3x384xbf16>
    %3 = vector.shape_cast %2 : vector<1x3x384xbf16> to vector<3x384xbf16>
    %4 = vector.extract_strided_slice %1 {offsets = [1, 0, 0], sizes = [1, 3, 384], strides = [1, 1, 1]} : vector<2x3x512xbf16> to vector<1x3x384xbf16>
    %5 = vector.shape_cast %4 : vector<1x3x384xbf16> to vector<3x384xbf16>
    %6 = tpu.concatenate %3, %5 in 1 : vector<3x384xbf16>, vector<3x384xbf16> -> vector<3x768xbf16>
    %7 = vector.extract_strided_slice %1 {offsets = [0, 0, 1], sizes = [1, 3, 384], strides = [1, 1, 1]} : vector<2x3x512xbf16> to vector<1x3x384xbf16>
    %8 = vector.shape_cast %7 : vector<1x3x384xbf16> to vector<3x384xbf16>
    %9 = vector.extract_strided_slice %1 {offsets = [1, 0, 1], sizes = [1, 3, 384], strides = [1, 1, 1]} : vector<2x3x512xbf16> to vector<1x3x384xbf16>
    %10 = vector.shape_cast %9 : vector<1x3x384xbf16> to vector<3x384xbf16>
    %11 = tpu.concatenate %8, %10 in 1 : vector<3x384xbf16>, vector<3x384xbf16> -> vector<3x768xbf16>
    %12 = vector.extract_strided_slice %1 {offsets = [0, 0, 2], sizes = [1, 3, 384], strides = [1, 1, 1]} : vector<2x3x512xbf16> to vector<1x3x384xbf16>
    %13 = vector.shape_cast %12 : vector<1x3x384xbf16> to vector<3x384xbf16>
    %14 = vector.extract_strided_slice %1 {offsets = [1, 0, 2], sizes = [1, 3, 384], strides = [1, 1, 1]} : vector<2x3x512xbf16> to vector<1x3x384xbf16>
    %15 = vector.shape_cast %14 : vector<1x3x384xbf16> to vector<3x384xbf16>
    %16 = tpu.concatenate %13, %15 in 1 : vector<3x384xbf16>, vector<3x384xbf16> -> vector<3x768xbf16>
    %17 = vector.extract_strided_slice %1 {offsets = [0, 0, 18], sizes = [1, 3, 384], strides = [1, 1, 1]} : vector<2x3x512xbf16> to vector<1x3x384xbf16>
    %18 = vector.shape_cast %17 : vector<1x3x384xbf16> to vector<3x384xbf16>
    %19 = vector.extract_strided_slice %1 {offsets = [1, 0, 18], sizes = [1, 3, 384], strides = [1, 1, 1]} : vector<2x3x512xbf16> to vector<1x3x384xbf16>
    %20 = vector.shape_cast %19 : vector<1x3x384xbf16> to vector<3x384xbf16>
    %21 = tpu.concatenate %18, %20 in 1 : vector<3x384xbf16>, vector<3x384xbf16> -> vector<3x768xbf16>
    %22 = vector.extract_strided_slice %1 {offsets = [0, 0, 19], sizes = [1, 3, 384], strides = [1, 1, 1]} : vector<2x3x512xbf16> to vector<1x3x384xbf16>
    %23 = vector.shape_cast %22 : vector<1x3x384xbf16> to vector<3x384xbf16>
    %24 = vector.extract_strided_slice %1 {offsets = [1, 0, 19], sizes = [1, 3, 384], strides = [1, 1, 1]} : vector<2x3x512xbf16> to vector<1x3x384xbf16>
    %25 = vector.shape_cast %24 : vector<1x3x384xbf16> to vector<3x384xbf16>
    %26 = tpu.concatenate %23, %25 in 1 : vector<3x384xbf16>, vector<3x384xbf16> -> vector<3x768xbf16>
    %27 = vector.extract_strided_slice %1 {offsets = [0, 0, 20], sizes = [1, 3, 384], strides = [1, 1, 1]} : vector<2x3x512xbf16> to vector<1x3x384xbf16>
    %28 = vector.shape_cast %27 : vector<1x3x384xbf16> to vector<3x384xbf16>
    %29 = vector.extract_strided_slice %1 {offsets = [1, 0, 20], sizes = [1, 3, 384], strides = [1, 1, 1]} : vector<2x3x512xbf16> to vector<1x3x384xbf16>
    %30 = vector.shape_cast %29 : vector<1x3x384xbf16> to vector<3x384xbf16>
    %31 = tpu.concatenate %28, %30 in 1 : vector<3x384xbf16>, vector<3x384xbf16> -> vector<3x768xbf16>
    %32 = vector.extract_strided_slice %1 {offsets = [0, 0, 36], sizes = [1, 3, 384], strides = [1, 1, 1]} : vector<2x3x512xbf16> to vector<1x3x384xbf16>
    %33 = vector.shape_cast %32 : vector<1x3x384xbf16> to vector<3x384xbf16>
    %34 = vector.extract_strided_slice %1 {offsets = [1, 0, 36], sizes = [1, 3, 384], strides = [1, 1, 1]} : vector<2x3x512xbf16> to vector<1x3x384xbf16>
    %35 = vector.shape_cast %34 : vector<1x3x384xbf16> to vector<3x384xbf16>
    %36 = tpu.concatenate %33, %35 in 1 : vector<3x384xbf16>, vector<3x384xbf16> -> vector<3x768xbf16>
    %37 = vector.extract_strided_slice %1 {offsets = [0, 0, 37], sizes = [1, 3, 384], strides = [1, 1, 1]} : vector<2x3x512xbf16> to vector<1x3x384xbf16>
    %38 = vector.shape_cast %37 : vector<1x3x384xbf16> to vector<3x384xbf16>
    %39 = vector.extract_strided_slice %1 {offsets = [1, 0, 37], sizes = [1, 3, 384], strides = [1, 1, 1]} : vector<2x3x512xbf16> to vector<1x3x384xbf16>
    %40 = vector.shape_cast %39 : vector<1x3x384xbf16> to vector<3x384xbf16>
    %41 = tpu.concatenate %38, %40 in 1 : vector<3x384xbf16>, vector<3x384xbf16> -> vector<3x768xbf16>
    %42 = vector.extract_strided_slice %1 {offsets = [0, 0, 38], sizes = [1, 3, 384], strides = [1, 1, 1]} : vector<2x3x512xbf16> to vector<1x3x384xbf16>
    %43 = vector.shape_cast %42 : vector<1x3x384xbf16> to vector<3x384xbf16>
    %44 = vector.extract_strided_slice %1 {offsets = [1, 0, 38], sizes = [1, 3, 384], strides = [1, 1, 1]} : vector<2x3x512xbf16> to vector<1x3x384xbf16>
    %45 = vector.shape_cast %44 : vector<1x3x384xbf16> to vector<3x384xbf16>
    %46 = tpu.concatenate %43, %45 in 1 : vector<3x384xbf16>, vector<3x384xbf16> -> vector<3x768xbf16>
    %cst = arith.constant 0.000000e+00 : bf16
    %47 = vector.broadcast %cst : bf16 to vector<5x768xbf16>
    %48 = tpu.concatenate %6, %11, %16, %21, %26, %31, %36, %41, %46, %47 in 0 : vector<3x768xbf16>, vector<3x768xbf16>, vector<3x768xbf16>, vector<3x768xbf16>, vector<3x768xbf16>, vector<3x768xbf16>, vector<3x768xbf16>, vector<3x768xbf16>, vector<3x768xbf16>, vector<5x768xbf16> -> vector<32x768xbf16>
    %cst_4 = arith.constant dense<0.000000e+00> : vector<48x768xf32>
    %49 = tpu.matmul %0, %48, %cst_4 {dimension_numbers = #tpu.dot_dimension_numbers<[1], [0], [0], [1], [0, 0, 1, 1], [], []>} : vector<48x32xbf16>, vector<32x768xbf16>, vector<48x768xf32> -> vector<48x768xf32>
    %50 = vector.extract_strided_slice %49 {offsets = [0, 0], sizes = [48, 384], strides = [1, 1]} : vector<48x768xf32> to vector<48x384xf32>
    %c0_5 = arith.constant 0 : index
    %c0_6 = arith.constant 0 : index
    %c0_7 = arith.constant 0 : index
    %51 = vector.load %arg3[%c0_5, %c0_6, %c0_7] : memref<2x48x384xf32, #tpu.memory_space<vmem>>, vector<1x48x384xf32>
    %52 = vector.shape_cast %51 : vector<1x48x384xf32> to vector<48x384xf32>
    %53 = vector.shape_cast %50 : vector<48x384xf32> to vector<1x48x384xf32>
    tpu.vector_store %arg3[%c0_5, %c0_6, %c0_7], %53 {strides = array<i32>} : memref<2x48x384xf32, #tpu.memory_space<vmem>>, vector<1x48x384xf32>,
    %54 = vector.extract_strided_slice %49 {offsets = [0, 384], sizes = [48, 384], strides = [1, 1]} : vector<48x768xf32> to vector<48x384xf32>
    %c1 = arith.constant 1 : index
    %c0_8 = arith.constant 0 : index
    %c0_9 = arith.constant 0 : index
    %55 = vector.load %arg3[%c1, %c0_8, %c0_9] : memref<2x48x384xf32, #tpu.memory_space<vmem>>, vector<1x48x384xf32>
    %56 = vector.shape_cast %55 : vector<1x48x384xf32> to vector<48x384xf32>
    %57 = vector.shape_cast %54 : vector<48x384xf32> to vector<1x48x384xf32>
    tpu.vector_store %arg3[%c1, %c0_8, %c0_9], %57 {strides = array<i32>} : memref<2x48x384xf32, #tpu.memory_space<vmem>>, vector<1x48x384xf32>,
    return
  }
  func.func @transform_0(%arg0: i32) -> (i32, i32, i32) {
    %c0_i32 = arith.constant 0 : i32
    %c0_i32_0 = arith.constant 0 : i32
    %c0_i32_1 = arith.constant 0 : i32
    %c0_i32_2 = arith.constant 0 : i32
    return %c0_i32, %c0_i32_0, %c0_i32_1 : i32, i32, i32
  }
  func.func @transform_1(%arg0: i32) -> (i32, i32) {
    %c0_i32 = arith.constant 0 : i32
    %c0_i32_0 = arith.constant 0 : i32
    %c0_i32_1 = arith.constant 0 : i32
    return %c0_i32, %c0_i32_0 : i32, i32
  }
  func.func @transform_2(%arg0: i32) -> (i32, i32, i32) {
    %c0_i32 = arith.constant 0 : i32
    %c0_i32_0 = arith.constant 0 : i32
    %c0_i32_1 = arith.constant 0 : i32
    %c0_i32_2 = arith.constant 0 : i32
    return %c0_i32, %c0_i32_0, %c0_i32_1 : i32, i32, i32
  }
}

</mosaic_0001>

<bundles_post_ra>
// kernel: overlap_patch_embed.1
= control target key start
LH: loop header
LB: loop body
LE: loop exit
PB: predicated region body
PF: predicated region fallthrough
CT: control target
= control target key end

     0   :  { %v25_v0 = vlaneseq  ;;  %v929_v2 = vmov 1983009808   ;;  %s930_s11 = smov 127   ;;  %s931_s12 = smov 110   ;;  %v938_v18 = vmov 0   ;;  %vm69_vm0 = vcmask 1039360   ;;  %s1458_s0 = inlined_call_operand.vmem [shape: bf16[2,3,512], index: 0, kind: input, shape index: {}]   ;;  %s1459_s1 = inlined_call_operand.vmem [shape: bf16[48,32], index: 1, kind: input, shape index: {}]   ;;  %s1460_s2 = inlined_call_operand.vmem [shape: f32[2,48,384], index: 2, kind: output, shape index: {}]  }
   0x1   :  { %v18_v1 = vld [vmem:[%s1458_s0] sm:$0xff]  ;;  %v23_v3 = vunpack.c.l.s4 %v929_v2  ;;  %s932_s13 = smov 126   ;;  %s933_s14 = smov 108   ;;  %v19_v11 = vld [vmem:[%s1458_s0 + $0x8] sm:$0xff]  ;;  %682 = vmatprep.mubr.bf16.mxu0 %v938_v18  ;;  %692 = vmatprep.mubr.bf16.mxu1 %v938_v18  ;;  %vm116_vm1 = vcmask 900096   ;;  %vm93_vm2 = vcmask 1031168  }
   0x2   :  { %v26_v4 = vshrl.u32 %v25_v0, 7  ;;  %v21_v6 = vcombine.high %v18_v1, %v18_v1  ;;  %s934_s15 = smov 91   ;;  %s935_s16 = smov 109   ;;  %v41_v12 = vcombine.high %v19_v11, %v19_v11  ;;  %vm480_vm3 = vcmask 1041408  }
   0x3   :  { %v24_v5 = vunpack.c.0.s8 %v23_v3  ;;  %s936_s17 = smov 92   ;;  %s937_s20 = smov 90   ;;  %vm481_vm4 = vsmask.f32 1280  ;;  %vm162_vm5 = vcmask 883712   ;;  %vm489_vm7 = vcmask 1042432  }
   0x4   :  { %vm1110_vm6 = vmand %vm480_vm3, %vm481_vm4  ;;  %vm514_vm8 = vcmask 1044480   ;;  %vm515_vm9 = vsmask.f32 4352  ;;  %vm1462_vm10 = vcmask 891904   ;;  %vm548_vm11 = vcmask 1047552  }
   0x5   :  { %v27_v7 = vsub.s32 %v24_v5, %v26_v4  ;;  %vm549_vm12 = vsmask.f32 7424  ;;  %vm1131_vm13 = vmand %vm514_vm8, %vm515_vm9  ;;  %vm523_vm14 = vcmask 1045504   ;;  %vm1461_vm15 = vcmask 744448  }
   0x6   :  { %vm1138_vm3 = vmand %vm548_vm11, %vm549_vm12  ;;  %vm185_vm4 = vcmask 752640   ;;  %vm1463_vm8 = vcmask 1040384   ;;  %vm583_vm9 = vsmask.f32 2304  ;;  %vm231_vm11 = vcmask 736256  }
   0x7   :  { %v957_v8 = vrot.slane %v18_v1, %v27_v7  ;;  %v959_v9 = vrot.slane %v21_v6, %v27_v7  ;;  %v1008_v13 = vrot.slane %v19_v11, %v27_v7  ;;  %v1014_v14 = vrot.slane %v41_v12, %v27_v7 }
   0x8   :  { %vm617_vm12 = vsmask.f32 5376 }
   0x9   :  { %61 = vrot.lane.b32.xlu1 %v957_v8, %s930_s11  ;;  %65 = vrot.lane.b32.xlu0 %v959_v9, %s930_s11  ;;  %v971_v10 = vcombine.high %v957_v8, %v957_v8  ;;  %v1022_v15 = vcombine.high %v1008_v13, %v1008_v13  ;;  %v73_v16 = vcombine.high %v1014_v14, %v1014_v14 }
   0xa   :  { %v60_v17 = vcombine.high %v959_v9, %v959_v9 }
   0xd   :  { %108 = vrot.lane.b32.xlu1 %v957_v8, %s931_s12  ;;  %112 = vrot.lane.b32.xlu0 %v959_v9, %s931_s12 }
  0x11   :  { %110 = vrot.lane.b32.xlu1 %v971_v10, %s931_s12  ;;  %63 = vrot.lane.b32.xlu0 %v971_v10, %s930_s11 }
  0x15   :  { %89 = vrot.lane.b32.xlu1 %v959_v9, %s932_s13  ;;  %87 = vrot.lane.b32.xlu0 %v971_v10, %s932_s13 }
  0x19   :  { %158 = vrot.lane.b32.xlu1 %v959_v9, %s933_s14  ;;  %156 = vrot.lane.b32.xlu0 %v971_v10, %s933_s14 }
  0x1d   :  { %154 = vrot.lane.b32.xlu1 %v957_v8, %s933_s14  ;;  %85 = vrot.lane.b32.xlu0 %v957_v8, %s932_s13 }
  0x21   :  { %204 = vrot.lane.b32.xlu1 %v959_v9, %s934_s15  ;;  %202 = vrot.lane.b32.xlu0 %v971_v10, %s934_s15 }
  0x25   :  { %135 = vrot.lane.b32.xlu1 %v959_v9, %s935_s16  ;;  %133 = vrot.lane.b32.xlu0 %v971_v10, %s935_s16 }
  0x29   :  { %131 = vrot.lane.b32.xlu1 %v957_v8, %s935_s16  ;;  %200 = vrot.lane.b32.xlu0 %v957_v8, %s934_s15 }
  0x2d   :  { %181 = vrot.lane.b32.xlu1 %v959_v9, %s936_s17  ;;  %179 = vrot.lane.b32.xlu0 %v971_v10, %s936_s17 }
  0x31   :  { %225 = vrot.lane.b32.xlu1 %v971_v10, %s937_s20  ;;  %177 = vrot.lane.b32.xlu0 %v957_v8, %s936_s17 }
  0x35   :  { %223 = vrot.lane.b32.xlu1 %v957_v8, %s937_s20  ;;  %227 = vrot.lane.b32.xlu0 %v959_v9, %s937_s20 }
  0x39   :  { %76 = vrot.lane.b32.xlu1 %v1022_v15, %s930_s11  ;;  %74 = vrot.lane.b32.xlu0 %v1008_v13, %s930_s11 }
  0x3d   :  { %80 = vrot.lane.b32.xlu1 %v73_v16, %s930_s11  ;;  %78 = vrot.lane.b32.xlu0 %v1014_v14, %s930_s11 }
  0x41   :  { %120 = vrot.lane.b32.xlu1 %v1008_v13, %s931_s12  ;;  %67 = vrot.lane.b32.xlu0 %v60_v17, %s930_s11 }
  0x45   :  { %124 = vrot.lane.b32.xlu1 %v1014_v14, %s931_s12  ;;  %122 = vrot.lane.b32.xlu0 %v1022_v15, %s931_s12 }
  0x49   :  { %114 = vrot.lane.b32.xlu1 %v60_v17, %s931_s12  ;;  %126 = vrot.lane.b32.xlu0 %v73_v16, %s931_s12 }
  0x4d   :  { %99 = vrot.lane.b32.xlu1 %v1022_v15, %s932_s13  ;;  %97 = vrot.lane.b32.xlu0 %v1008_v13, %s932_s13 }
  0x51   :  { %103 = vrot.lane.b32.xlu1 %v73_v16, %s932_s13  ;;  %101 = vrot.lane.b32.xlu0 %v1014_v14, %s932_s13 }
  0x55   :  { %168 = vrot.lane.b32.xlu1 %v1022_v15, %s933_s14  ;;  %166 = vrot.lane.b32.xlu0 %v1008_v13, %s933_s14 }
  0x59   :  { %172 = vrot.lane.b32.xlu1 %v73_v16, %s933_s14  ;;  %170 = vrot.lane.b32.xlu0 %v1014_v14, %s933_s14 }
  0x5d   :  { %160 = vrot.lane.b32.xlu1 %v60_v17, %s933_s14  ;;  %91 = vrot.lane.b32.xlu0 %v60_v17, %s932_s13 }
  0x61   :  { %214 = vrot.lane.b32.xlu1 %v1022_v15, %s934_s15  ;;  %212 = vrot.lane.b32.xlu0 %v1008_v13, %s934_s15 }
  0x65   :  { %218 = vrot.lane.b32.xlu1 %v73_v16, %s934_s15  ;;  %216 = vrot.lane.b32.xlu0 %v1014_v14, %s934_s15 }
  0x69   :  { %145 = vrot.lane.b32.xlu1 %v1022_v15, %s935_s16  ;;  %143 = vrot.lane.b32.xlu0 %v1008_v13, %s935_s16 }
  0x6d   :  { %149 = vrot.lane.b32.xlu1 %v73_v16, %s935_s16  ;;  %147 = vrot.lane.b32.xlu0 %v1014_v14, %s935_s16 }
  0x71   :  { %137 = vrot.lane.b32.xlu1 %v60_v17, %s935_s16  ;;  %206 = vrot.lane.b32.xlu0 %v60_v17, %s934_s15 }
  0x75   :  { %191 = vrot.lane.b32.xlu1 %v1022_v15, %s936_s17  ;;  %189 = vrot.lane.b32.xlu0 %v1008_v13, %s936_s17 }
  0x79   :  { %195 = vrot.lane.b32.xlu1 %v73_v16, %s936_s17  ;;  %193 = vrot.lane.b32.xlu0 %v1014_v14, %s936_s17 }
  0x7b   :  { %v62_v19 = vpop.permute.xlu1 %61  ;;  %v1085_v20 = vpop.permute.xlu0 %65 }
  0x7d   :  { %235 = vrot.lane.b32.xlu1 %v1008_v13, %s937_s20  ;;  %183 = vrot.lane.b32.xlu0 %v60_v17, %s936_s17 }
  0x7f   :  { %v109_v21 = vpop.permute.xlu1 %108  ;;  %v1090_v22 = vpop.permute.xlu0 %112 }
  0x81   :  { %239 = vrot.lane.b32.xlu1 %v1014_v14, %s937_s20  ;;  %237 = vrot.lane.b32.xlu0 %v1022_v15, %s937_s20 }
  0x83   :  { %v111_v23 = vpop.permute.xlu1 %110  ;;  %v64_v24 = vpop.permute.xlu0 %63 }
  0x84   :  { %v71_v25 = vsel %vm69_vm0, %v64_v24, %v1085_v20  ;;  %v70_v30 = vsel %vm69_vm0, %v62_v19, %v64_v24  ;;  %v118_v35 = vsel %vm116_vm1, %v111_v23, %v1090_v22  ;;  %v117_v38 = vsel %vm116_vm1, %v109_v21, %v111_v23 }
  0x85   :  { %229 = vrot.lane.b32.xlu1 %v60_v17, %s937_s20  ;;  %241 = vrot.lane.b32.xlu0 %v73_v16, %s937_s20  ;;  %v255_v28 = vshrl.u32 %v71_v25, 16  ;;  %v258_v29 = vshll.u32 %v71_v25, 16  ;;  %v247_v36 = vshrl.u32 %v70_v30, 16  ;;  %v250_v37 = vshll.u32 %v70_v30, 16 }
  0x86   :  { %v315_v41 = vshrl.u32 %v118_v35, 16  ;;  %v318_v42 = vshll.u32 %v118_v35, 16  ;;  %v307_v48 = vshrl.u32 %v117_v38, 16  ;;  %v310_v49 = vshll.u32 %v117_v38, 16 }
  0x87   :  { %v1100_v26 = vpop.permute.xlu1 %89  ;;  %v88_v27 = vpop.permute.xlu0 %87  ;;  %v257_v33 = vrot.slane %v255_v28, 6  ;;  %v260_v34 = vrot.slane %v258_v29, 7  ;;  %v249_v46 = vrot.slane %v247_v36, 6  ;;  %v252_v47 = vrot.slane %v250_v37, 7 }
  0x88   :  { %v95_v44 = vsel %vm93_vm2, %v88_v27, %v1100_v26  ;;  %v317_v54 = vrot.slane %v315_v41, 3  ;;  %v320_v55 = vrot.slane %v318_v42, 4  ;;  %v309_v2 = vrot.slane %v307_v48, 3 }
  0x89   :  { %v261_v43 = vor.u32 %v260_v34, %v257_v33  ;;  %v301_v50 = vrot.slane %v95_v44, 5  ;;  %v253_v58 = vor.u32 %v252_v47, %v249_v46  ;;  %v312_v3 = vrot.slane %v310_v49, 4 }
  0x8a   :  { %v321_v4 = vor.u32 %v320_v55, %v317_v54 }
  0x8b   :  { %v1103_v31 = vpop.permute.xlu1 %158  ;;  %v157_v32 = vpop.permute.xlu0 %156  ;;  %v484_v56 = vsel %vm1110_vm6, %v971_v10, %v261_v43  ;;  %v483_v12 = vsel %vm1110_vm6, %v957_v8, %v253_v58  ;;  %v313_v24 = vor.u32 %v312_v3, %v309_v2 }
  0x8c   :  { %v1116_v51 = vsel %vm162_vm5, %v157_v32, %v1103_v31  ;;  %v496_v60 = vsel %vm489_vm7, %v484_v56, %v301_v50 }
  0x8d   :  { %v371_v59 = vshll.u32 %v1116_v51, 16  ;;  %v518_v16 = vsel %vm1131_vm13, %v496_v60, %v321_v4  ;;  %v393_v42 = vshrl.u32 %v1116_v51, 16 }
  0x8f   :  { %v155_v39 = vpop.permute.xlu1 %154  ;;  %v86_v40 = vpop.permute.xlu0 %85  ;;  %v373_v10 = vrot.slane %v371_v59, 1 }
  0x90   :  { %v94_v57 = vsel %vm93_vm2, %v86_v40, %v88_v27  ;;  %v163_v61 = vsel %vm162_vm5, %v155_v39, %v157_v32 }
  0x91   :  { %v300_v62 = vrot.slane %v94_v57, 5  ;;  %v367_v11 = vshll.u32 %v163_v61, 16  ;;  %v390_v43 = vshrl.u32 %v163_v61, 16  ;;  %v395_v55 = vor.u32 %v393_v42, %v373_v10 }
  0x93   :  { %v1118_v52 = vpop.permute.xlu1 %204  ;;  %v203_v53 = vpop.permute.xlu0 %202  ;;  %v492_v17 = vsel %vm489_vm7, %v483_v12, %v300_v62  ;;  %v369_v30 = vrot.slane %v367_v11, 1 }
  0x94   :  { %v210_v25 = vsel %vm1461_vm15, %v203_v53, %v1118_v52  ;;  %v517_v32 = vsel %vm1131_vm13, %v492_v17, %v313_v24 }
  0x95   :  { %v429_v33 = vshrl.u32 %v210_v25, 16  ;;  %v432_v34 = vshll.u32 %v210_v25, 16  ;;  %v392_v56 = vor.u32 %v390_v43, %v369_v30 }
  0x97   :  { %v1127_v63 = vpop.permute.xlu1 %135  ;;  %v134_v0 = vpop.permute.xlu0 %133  ;;  %v431_v44 = vrot.slane %v429_v33, 5  ;;  %v434_v49 = vrot.slane %v432_v34, 6 }
  0x98   :  { %v141_v5 = vsel %vm1462_vm10, %v134_v0, %v1127_v63 }
  0x99   :  { %v361_v6 = vrot.slane %v141_v5, 2  ;;  %v435_v62 = vor.u32 %v434_v49, %v431_v44 }
  0x9b   :  { %v132_v19 = vpop.permute.xlu1 %131  ;;  %v201_v21 = vpop.permute.xlu0 %200  ;;  %v530_v23 = vsel %vm523_vm14, %v518_v16, %v361_v6 }
  0x9c   :  { %v140_v27 = vsel %vm1462_vm10, %v132_v19, %v134_v0  ;;  %v552_v28 = vsel %vm1138_vm3, %v530_v23, %v373_v10  ;;  %v209_v8 = vsel %vm1461_vm15, %v201_v21, %v203_v53  ;;  %vm1172_vm15 = vmand %vm489_vm7, %vm583_vm9  ;;  %vm591_vm10 = vcmask 1043456  }
  0x9d   :  { %v360_v29 = vrot.slane %v140_v27, 2  ;;  %650 = vmatprep.subr.bf16.mxu0 %v552_v28  ;;  %910 = vmatprep.subr.bf16.mxu1 %v552_v28  ;;  %v421_v38 = vshrl.u32 %v209_v8, 16  ;;  %v424_v39 = vshll.u32 %v209_v8, 16  ;;  %v1198_v28 = vld [vmem:[%s1459_s1] sm:$0xff]   ;;  %vm640_vm9 = vcmask 261120  }
  0x9f   :  { %v1157_v35 = vpop.permute.xlu1 %181  ;;  %v180_v36 = vpop.permute.xlu0 %179  ;;  %v526_v37 = vsel %vm523_vm14, %v517_v32, %v360_v29  ;;  %v423_v50 = vrot.slane %v421_v38, 5  ;;  %v426_v53 = vrot.slane %v424_v39, 6  ;;  %v1203_v29 = vld [vmem:[%s1459_s1 + $0x8] sm:$0xff]  }
  0xa0   :  { %v187_v40 = vsel %vm185_vm4, %v180_v36, %v1157_v35  ;;  %v551_v41 = vsel %vm1138_vm3, %v526_v37, %v369_v30 }
  0xa1   :  { %651 = vmatpush1.bf16.msra.mxu0 %v551_v41  ;;  %912 = vmatpush1.bf16.msra.mxu1 %v551_v41  ;;  %v415_v46 = vrot.slane %v187_v40, 7  ;;  %v427_v0 = vor.u32 %v426_v53, %v423_v50 }
  0xa3   :  { %v226_v47 = vpop.permute.xlu1 %225  ;;  %v178_v48 = vpop.permute.xlu0 %177  ;;  %v564_v58 = vsel %vm1463_vm8, %v395_v55, %v415_v46 }
  0xa4   :  { %v186_v54 = vsel %vm185_vm4, %v178_v48, %v180_v36  ;;  %v586_v10 = vsel %vm1172_vm15, %v564_v58, %v435_v62 }
  0xa5   :  { %v414_v57 = vrot.slane %v186_v54, 7 }
  0xa7   :  { %v560_v59 = vsel %vm1463_vm8, %v392_v56, %v414_v57  ;;  %v224_v51 = vpop.permute.xlu1 %223  ;;  %v1168_v60 = vpop.permute.xlu0 %227  ;;  %vm1180_vm8 = vmand %vm523_vm14, %vm617_vm12  ;;  %v1221_v56 = vld [vmem:[%s1459_s1 + $0x10] sm:$0xff]  }
  0xa8   :  { %v232_v2 = vsel %vm231_vm11, %v224_v51, %v226_v47  ;;  %v233_v3 = vsel %vm231_vm11, %v226_v47, %v1168_v60  ;;  %v585_v11 = vsel %vm1172_vm15, %v560_v59, %v427_v0 }
  0xa9   :  { %v474_v4 = vrot.slane %v232_v2, 4  ;;  %v475_v5 = vrot.slane %v233_v3, 4 }
  0xab   :  { %v77_v12 = vpop.permute.xlu1 %76  ;;  %v75_v16 = vpop.permute.xlu0 %74  ;;  %v598_v17 = vsel %vm591_vm10, %v586_v10, %v475_v5  ;;  %v594_v19 = vsel %vm591_vm10, %v585_v11, %v474_v4 }
  0xac   :  { %v82_v21 = vsel %vm69_vm0, %v75_v16, %v77_v12  ;;  %v620_v23 = vsel %vm1180_vm8, %v598_v17, 0  ;;  %v619_v24 = vsel %vm1180_vm8, %v594_v19, 0 }
  0xad   :  { %v271_v25 = vshrl.u32 %v82_v21, 16  ;;  %v274_v27 = vshll.u32 %v82_v21, 16  ;;  %652 = vmatprep.subr.bf16.mxu0 %v620_v23  ;;  %911 = vmatprep.subr.bf16.mxu1 %v620_v23 }
  0xae   :  { %653 = vmatpush1.bf16.msra.mxu0 %v619_v24  ;;  %913 = vmatpush1.bf16.msra.mxu1 %v619_v24 }
  0xaf   :  { %v273_v8 = vrot.slane %v271_v25, 6  ;;  %v276_v30 = vrot.slane %v274_v27, 7  ;;  %v81_v32 = vpop.permute.xlu1 %80  ;;  %v79_v33 = vpop.permute.xlu0 %78 }
  0xb0   :  { %v83_v34 = vsel %vm69_vm0, %v77_v12, %v79_v33  ;;  %v84_v36 = vsel %vm69_vm0, %v79_v33, %v81_v32 }
  0xb1   :  { %v277_v37 = vor.u32 %v276_v30, %v273_v8  ;;  %v279_v38 = vshrl.u32 %v83_v34, 16  ;;  %v282_v39 = vshll.u32 %v83_v34, 16  ;;  %v287_v40 = vshrl.u32 %v84_v36, 16  ;;  %883 = vmatmul.mubr.msk.bf16.vlgmr.msra.gmra.mrb[0].mxu0 %vm640_vm9, %v1198_v28  ;;  %884 = vmatmul.mubr.msk.bf16.vlgmr.msra.gmra.mrb[0].mxu1 %vm640_vm9, %v1203_v29 }
  0xb2   :  { %v290_v41 = vshll.u32 %v84_v36, 16  ;;  %702 = vmatprep.mubr.bf16.mxu1 %v938_v18  ;;  %808 = vmatprep.mubr.bf16.mxu0 %v938_v18 }
  0xb3   :  { %v281_v42 = vrot.slane %v279_v38, 6  ;;  %v284_v43 = vrot.slane %v282_v39, 7  ;;  %v289_v44 = vrot.slane %v287_v40, 6  ;;  %v121_v46 = vpop.permute.xlu1 %120  ;;  %v68_v47 = vpop.permute.xlu0 %67  ;;  %v486_v48 = vsel %vm1110_vm6, %v1008_v13, %v277_v37 }
  0xb4   :  { %v292_v49 = vrot.slane %v290_v41, 7  ;;  %v72_v50 = vsel %vm69_vm0, %v1085_v20, %v68_v47  ;;  %vm1474_vm0 = vcmask 891904  }
  0xb5   :  { %v285_v53 = vor.u32 %v284_v43, %v281_v42  ;;  %v263_v54 = vshrl.u32 %v72_v50, 16  ;;  %v266_v55 = vshll.u32 %v72_v50, 16 }
  0xb6   :  { %v293_v57 = vor.u32 %v292_v49, %v289_v44 }
  0xb7   :  { %v265_v58 = vrot.slane %v263_v54, 6  ;;  %v268_v59 = vrot.slane %v266_v55, 7  ;;  %v125_v51 = vpop.permute.xlu1 %124  ;;  %v123_v62 = vpop.permute.xlu0 %122  ;;  %v487_v13 = vsel %vm1110_vm6, %v1022_v15, %v285_v53 }
  0xb8   :  { %v128_v0 = vsel %vm116_vm1, %v121_v46, %v123_v62  ;;  %v488_v20 = vsel %vm1110_vm6, %v1014_v14, %v293_v57  ;;  %v129_v3 = vsel %vm116_vm1, %v123_v62, %v125_v51 }
  0xb9   :  { %v269_v2 = vor.u32 %v268_v59, %v265_v58  ;;  %885 = vmatmul.mubr.msk.bf16.gmra.mrb[4].mxu1 %vm640_vm9, %v1221_v56  ;;  %v331_v4 = vshrl.u32 %v128_v0, 16  ;;  %v334_v5 = vshll.u32 %v128_v0, 16  ;;  %v339_v16 = vshrl.u32 %v129_v3, 16 }
  0xba   :  { %745 = vmatprep.mubr.bf16.mxu1 %v938_v18  ;;  %v342_v17 = vshll.u32 %v129_v3, 16 }
  0xbb   :  { %v115_v10 = vpop.permute.xlu1 %114  ;;  %v127_v11 = vpop.permute.xlu0 %126  ;;  %v485_v15 = vsel %vm1110_vm6, %v959_v9, %v269_v2  ;;  %v333_v19 = vrot.slane %v331_v4, 3  ;;  %v336_v21 = vrot.slane %v334_v5, 4  ;;  %v341_v30 = vrot.slane %v339_v16, 3 }
  0xbc   :  { %v119_v12 = vsel %vm116_vm1, %v1090_v22, %v115_v10  ;;  %v130_v14 = vsel %vm116_vm1, %v125_v51, %v127_v11  ;;  %v344_v45 = vrot.slane %v342_v17, 4  ;;  %vm1475_vm1 = vmmov %vm1474_vm0  ;;  %vm1478_vm6 = vcmask 744448  }
  0xbd   :  { %v347_v23 = vshrl.u32 %v130_v14, 16  ;;  %v350_v24 = vshll.u32 %v130_v14, 16  ;;  %v337_v33 = vor.u32 %v336_v21, %v333_v19  ;;  %v323_v54 = vshrl.u32 %v119_v12, 16  ;;  %vm1481_vm12 = vmmov %vm1478_vm6 }
  0xbe   :  { %v345_v43 = vor.u32 %v344_v45, %v341_v30  ;;  %v326_v55 = vshll.u32 %v119_v12, 16 }
  0xbf   :  { %v100_v25 = vpop.permute.xlu1 %99  ;;  %v98_v27 = vpop.permute.xlu0 %97  ;;  %v349_v9 = vrot.slane %v347_v23, 3  ;;  %v352_v34 = vrot.slane %v350_v24, 4  ;;  %v325_v59 = vrot.slane %v323_v54, 3 }
  0xc0   :  { %v105_v8 = vsel %vm93_vm2, %v98_v27, %v100_v25  ;;  %v328_v51 = vrot.slane %v326_v55, 4 }
  0xc1   :  { %v303_v32 = vrot.slane %v105_v8, 5  ;;  %v353_v44 = vor.u32 %v352_v34, %v349_v9 }
  0xc2   :  { %v329_v2 = vor.u32 %v328_v51, %v325_v59 }
  0xc3   :  { %v504_v22 = vsel %vm489_vm7, %v486_v48, %v303_v32  ;;  %v104_v36 = vpop.permute.xlu1 %103  ;;  %v102_v37 = vpop.permute.xlu0 %101 }
  0xc4   :  { %v106_v38 = vsel %vm93_vm2, %v100_v25, %v102_v37  ;;  %v107_v39 = vsel %vm93_vm2, %v102_v37, %v104_v36  ;;  %v520_v40 = vsel %vm1131_vm13, %v504_v22, %v337_v33 }
  0xc5   :  { %v304_v41 = vrot.slane %v106_v38, 5  ;;  %v305_v42 = vrot.slane %v107_v39, 5 }
  0xc7   :  { %v508_v46 = vsel %vm489_vm7, %v487_v13, %v304_v41  ;;  %v512_v47 = vsel %vm489_vm7, %v488_v20, %v305_v42  ;;  %v169_v49 = vpop.permute.xlu1 %168  ;;  %v167_v50 = vpop.permute.xlu0 %166 }
  0xc8   :  { %v522_v48 = vsel %vm1131_vm13, %v512_v47, %v353_v44  ;;  %v521_v53 = vsel %vm1131_vm13, %v508_v46, %v345_v43  ;;  %v174_v11 = vsel %vm162_vm5, %v167_v50, %v169_v49 }
  0xc9   :  { %v379_v16 = vshll.u32 %v174_v11, 16 }
  0xcb   :  { %v173_v57 = vpop.permute.xlu1 %172  ;;  %v171_v58 = vpop.permute.xlu0 %170 }
  0xcc   :  { %v1259_v17 = vsel %vm162_vm5, %v169_v49, %v171_v58  ;;  %v1262_v19 = vsel %vm162_vm5, %v171_v58, %v173_v57 }
  0xcd   :  { %v383_v1 = vshll.u32 %v1259_v17, 16  ;;  %v387_v25 = vshll.u32 %v1262_v19, 16 }
  0xcf   :  { %v161_v62 = vpop.permute.xlu1 %160  ;;  %v92_v0 = vpop.permute.xlu0 %91  ;;  %v385_v36 = vrot.slane %v383_v1, 1  ;;  %v1276_v37 = vrot.slane %v387_v25, 1 }
  0xd0   :  { %v96_v13 = vsel %vm93_vm2, %v1100_v26, %v92_v0  ;;  %v1269_v27 = vsel %vm162_vm5, %v1103_v31, %v161_v62  ;;  %vm1476_vm2 = vmmov %vm1474_vm0  ;;  %v399_v62 = vshrl.u32 %v174_v11, 16 }
  0xd1   :  { %v302_v20 = vrot.slane %v96_v13, 5  ;;  %v375_v31 = vshll.u32 %v1269_v27, 16  ;;  %vm1477_vm5 = vmmov %vm1474_vm0  ;;  %v396_v25 = vshrl.u32 %v1269_v27, 16 }
  0xd3   :  { %v215_v3 = vpop.permute.xlu1 %214  ;;  %v213_v4 = vpop.permute.xlu0 %212  ;;  %v500_v5 = vsel %vm489_vm7, %v485_v15, %v302_v20  ;;  %v381_v15 = vrot.slane %v379_v16, 1  ;;  %v377_v47 = vrot.slane %v375_v31, 1  ;;  %vm1479_vm7 = vmmov %vm1478_vm6  ;;  %v402_v16 = vshrl.u32 %v1259_v17, 16 }
  0xd4   :  { %v519_v10 = vsel %vm1131_vm13, %v500_v5, %v329_v2  ;;  %v220_v49 = vsel %vm1478_vm6, %v213_v4, %v215_v3  ;;  %vm1480_vm13 = vmmov %vm1478_vm6 }
  0xd5   :  { %v445_v54 = vshrl.u32 %v220_v49, 16  ;;  %v448_v55 = vshll.u32 %v220_v49, 16  ;;  %v401_v4 = vor.u32 %v399_v62, %v381_v15 }
  0xd7   :  { %v219_v12 = vpop.permute.xlu1 %218  ;;  %v217_v14 = vpop.permute.xlu0 %216  ;;  %v447_v13 = vrot.slane %v445_v54, 5  ;;  %v450_v20 = vrot.slane %v448_v55, 6 }
  0xd8   :  { %v221_v57 = vsel %vm1479_vm7, %v215_v3, %v217_v14  ;;  %v222_v58 = vsel %vm1480_vm13, %v217_v14, %v219_v12 }
  0xd9   :  { %v453_v7 = vshrl.u32 %v221_v57, 16  ;;  %v456_v5 = vshll.u32 %v221_v57, 16 }
  0xdb   :  { %v146_v26 = vpop.permute.xlu1 %145  ;;  %v144_v21 = vpop.permute.xlu0 %143  ;;  %v455_v17 = vrot.slane %v453_v7, 5 }
  0xdc   :  { %v151_v23 = vsel %vm1474_vm0, %v144_v21, %v146_v26 }
  0xdd   :  { %v363_v24 = vrot.slane %v151_v23, 2 }
  0xdf   :  { %v150_v8 = vpop.permute.xlu1 %149  ;;  %v148_v30 = vpop.permute.xlu0 %147  ;;  %v538_v32 = vsel %vm523_vm14, %v520_v40, %v363_v24 }
  0xe0   :  { %v152_v33 = vsel %vm1475_vm1, %v146_v26, %v148_v30  ;;  %v153_v45 = vsel %vm1476_vm2, %v148_v30, %v150_v8  ;;  %v554_v9 = vsel %vm1138_vm3, %v538_v32, %v381_v15  ;;  %v464_v26 = vshll.u32 %v222_v58, 16 }
  0xe1   :  { %v364_v34 = vrot.slane %v152_v33, 2  ;;  %v365_v22 = vrot.slane %v153_v45, 2  ;;  %713 = vmatprep.subr.bf16.mxu1 %v554_v9  ;;  %v405_v15 = vshrl.u32 %v1262_v19, 16  ;;  %v451_v8 = vor.u32 %v450_v20, %v447_v13 }
  0xe2   :  { %v458_v30 = vrot.slane %v456_v5, 6  ;;  %v466_v45 = vrot.slane %v464_v26, 6 }
  0xe3   :  { %v138_v38 = vpop.permute.xlu1 %137  ;;  %v207_v39 = vpop.permute.xlu0 %206  ;;  %v546_v41 = vsel %vm523_vm14, %v522_v48, %v365_v22  ;;  %v542_v40 = vsel %vm523_vm14, %v521_v53, %v364_v34  ;;  %v407_v27 = vor.u32 %v405_v15, %v1276_v37 }
  0xe4   :  { %v142_v42 = vsel %vm1477_vm5, %v1127_v63, %v138_v38  ;;  %v556_v43 = vsel %vm1138_vm3, %v546_v41, %v1276_v37  ;;  %v555_v44 = vsel %vm1138_vm3, %v542_v40, %v385_v36  ;;  %v211_v2 = vsel %vm1481_vm12, %v1118_v52, %v207_v39 }
  0xe5   :  { %v362_v46 = vrot.slane %v142_v42, 2  ;;  %776 = vmatprep.subr.bf16.mxu0 %v556_v43  ;;  %v437_v11 = vshrl.u32 %v211_v2, 16  ;;  %v440_v23 = vshll.u32 %v211_v2, 16  ;;  %v404_v52 = vor.u32 %v402_v16, %v385_v36 }
  0xe6   :  { %777 = vmatpush1.bf16.msra.mxu0 %v555_v44  ;;  %v398_v36 = vor.u32 %v396_v25, %v377_v47  ;;  %v459_v42 = vor.u32 %v458_v30, %v455_v17 }
  0xe7   :  { %v192_v50 = vpop.permute.xlu1 %191  ;;  %v190_v48 = vpop.permute.xlu0 %189  ;;  %v534_v53 = vsel %vm523_vm14, %v519_v10, %v362_v46  ;;  %v461_v10 = vshrl.u32 %v222_v58, 16  ;;  %vm1482_vm14 = vcmask 1040384   ;;  %v439_v39 = vrot.slane %v437_v11, 5 }
  0xe8   :  { %v553_v63 = vsel %vm1138_vm3, %v534_v53, %v377_v47  ;;  %v197_v0 = vsel %vm185_vm4, %v190_v48, %v192_v50  ;;  %v442_v41 = vrot.slane %v440_v23, 6  ;;  %vm1483_vm3 = vmmov %vm1482_vm14 }
  0xe9   :  { %714 = vmatpush1.bf16.msra.mxu1 %v553_v63  ;;  %v417_v3 = vrot.slane %v197_v0, 7  ;;  %v463_v32 = vrot.slane %v461_v10, 5  ;;  %vm1485_vm0 = vmmov %vm1483_vm3 }
  0xea   :  { %v443_v55 = vor.u32 %v442_v41, %v439_v39 }
  0xeb   :  { %v196_v59 = vpop.permute.xlu1 %195  ;;  %v194_v51 = vpop.permute.xlu0 %193  ;;  %v572_v9 = vsel %vm1482_vm14, %v401_v4, %v417_v3  ;;  %v467_v49 = vor.u32 %v466_v45, %v463_v32 }
  0xec   :  { %v198_v12 = vsel %vm185_vm4, %v192_v50, %v194_v51  ;;  %v199_v24 = vsel %vm185_vm4, %v194_v51, %v196_v59  ;;  %v588_v46 = vsel %vm1172_vm15, %v572_v9, %v451_v8 }
  0xed   :  { %v418_v33 = vrot.slane %v198_v12, 7  ;;  %v419_v34 = vrot.slane %v199_v24, 7 }
  0xef   :  { %v236_v14 = vpop.permute.xlu1 %235  ;;  %v184_v21 = vpop.permute.xlu0 %183  ;;  %v576_v43 = vsel %vm1483_vm3, %v404_v52, %v418_v33 }
  0xf0   :  { %v188_v1 = vsel %vm185_vm4, %v1157_v35, %v184_v21  ;;  %vm1484_vm4 = vmmov %vm1483_vm3  ;;  %v589_v51 = vsel %vm1172_vm15, %v576_v43, %v459_v42 }
  0xf1   :  { %v416_v22 = vrot.slane %v188_v1, 7  ;;  %v580_v50 = vsel %vm1484_vm4, %v407_v27, %v419_v34 }
  0xf2   :  { %v590_v0 = vsel %vm1172_vm15, %v580_v50, %v467_v49 }
  0xf3   :  { %v240_v31 = vpop.permute.xlu1 %239  ;;  %v238_v38 = vpop.permute.xlu0 %237  ;;  %v568_v48 = vsel %vm1485_vm0, %v398_v36, %v416_v22 }
  0xf4   :  { %v243_v35 = vsel %vm231_vm11, %v236_v14, %v238_v38  ;;  %v244_v19 = vsel %vm231_vm11, %v238_v38, %v240_v31  ;;  %v587_v62 = vsel %vm1172_vm15, %v568_v48, %v443_v55 }
  0xf5   :  { %v477_v40 = vrot.slane %v243_v35, 4  ;;  %v478_v44 = vrot.slane %v244_v19, 4 }
  0xf7   :  { %v230_v53 = vpop.permute.xlu1 %229  ;;  %v242_v63 = vpop.permute.xlu0 %241  ;;  %v606_v54 = vsel %vm591_vm10, %v588_v46, %v477_v40  ;;  %v610_v13 = vsel %vm591_vm10, %v589_v51, %v478_v44 }
  0xf8   :  { %v234_v37 = vsel %vm231_vm11, %v1168_v60, %v230_v53  ;;  %v245_v47 = vsel %vm231_vm11, %v240_v31, %v242_v63  ;;  %v622_v57 = vsel %vm1180_vm8, %v606_v54, 0  ;;  %v623_v7 = vsel %vm1180_vm8, %v610_v13, 0 }
  0xf9   :  { %v476_v58 = vrot.slane %v234_v37, 4  ;;  %v479_v59 = vrot.slane %v245_v47, 4  ;;  %715 = vmatprep.subr.bf16.mxu1 %v622_v57 }
  0xfb   :  { %v602_v60 = vsel %vm591_vm10, %v587_v62, %v476_v58  ;;  %v614_v20 = vsel %vm591_vm10, %v590_v0, %v479_v59 }
  0xfc   :  { %v621_v2 = vsel %vm1180_vm8, %v602_v60, 0  ;;  %v624_v4 = vsel %vm1180_vm8, %v614_v20, 0 }
  0xfd   :  { %716 = vmatpush1.bf16.msra.mxu1 %v621_v2  ;;  %778 = vmatprep.subr.bf16.mxu0 %v624_v4 }
  0xfe   :  { %779 = vmatpush1.bf16.msra.mxu0 %v623_v7 }
 0x100   :  { %886 = vmatmul.mubr.msk.bf16.vlgmr.msra.gmra.mrb[8].mxu1 %vm640_vm9, %v1198_v28 }
 0x101   :  { %889 = vmatmul.mubr.msk.bf16.vlgmr.msra.gmra.mrb[4].mxu0 %vm640_vm9, %v1198_v28  ;;  %755 = vmatprep.mubr.bf16.mxu1 %v938_v18 }
 0x102   :  { %818 = vmatprep.mubr.bf16.mxu0 %v938_v18 }
 0x108   :  { %887 = vmatmul.mubr.msk.bf16.gmra.mrb[12].mxu1 %vm640_vm9, %v1203_v29 }
 0x109   :  { %890 = vmatmul.mubr.msk.bf16.gmra.mrb[8].mxu0 %vm640_vm9, %v1203_v29  ;;  %765 = vmatprep.mubr.bf16.mxu1 %v938_v18 }
 0x10a   :  { %828 = vmatprep.mubr.bf16.mxu0 %v938_v18 }
 0x110   :  { %888 = vmatmul.mubr.msk.bf16.gmra.mrb[16].mxu1 %vm640_vm9, %v1221_v56 }
 0x111   :  { %891 = vmatmul.mubr.msk.bf16.gmra.mrb[12].mxu0 %vm640_vm9, %v1221_v56 }
 0x184   :  { %v694_v61 = vpop.f32.mrb[0].mxu1  ;;  %v684_v6 = vpop.f32.mrb[0].mxu0 }
 0x185   :  { %845 = vst [vmem:[%s1460_s2 + $0x30] sm:$0xff] %v694_v61  ;;  %v696_v28 = vpop.f32.mrb[1].mxu1  ;;  %839 = vst [vmem:[%s1460_s2] sm:$0xff] %v684_v6  ;;  %v686_v29 = vpop.f32.mrb[1].mxu0 }
 0x186   :  { %846 = vst [vmem:[%s1460_s2 + $0x38] sm:$0xff] %v696_v28  ;;  %v698_v18 = vpop.f32.mrb[2].mxu1  ;;  %840 = vst [vmem:[%s1460_s2 + $0x8] sm:$0xff] %v686_v29  ;;  %v688_v56 = vpop.f32.mrb[2].mxu0 }
 0x187   :  { %848 = vst [vmem:[%s1460_s2 + $0x48] sm:$0xff] %v698_v18  ;;  %v700_v5 = vpop.f32.mrb[3].mxu1  ;;  %842 = vst [vmem:[%s1460_s2 + $0x18] sm:$0xff] %v688_v56  ;;  %v690_v10 = vpop.f32.mrb[3].mxu0 }
 0x188   :  { %849 = vst [vmem:[%s1460_s2 + $0x50] sm:$0xff] %v700_v5  ;;  %843 = vst [vmem:[%s1460_s2 + $0x20] sm:$0xff] %v690_v10 }
 0x18c   :  { %v704_v16 = vpop.f32.mrb[4].mxu1 }
 0x18d   :  { %851 = vst [vmem:[%s1460_s2 + $0x60] sm:$0xff] %v704_v16  ;;  %v706_v26 = vpop.f32.mrb[5].mxu1 }
 0x18e   :  { %852 = vst [vmem:[%s1460_s2 + $0x68] sm:$0xff] %v706_v26  ;;  %v708_v3 = vpop.f32.mrb[6].mxu1 }
 0x18f   :  { %854 = vst [vmem:[%s1460_s2 + $0x78] sm:$0xff] %v708_v3  ;;  %v710_v12 = vpop.f32.mrb[7].mxu1 }
 0x190   :  { %855 = vst [vmem:[%s1460_s2 + $0x80] sm:$0xff] %v710_v12 }
 0x1d3   :  { %v747_v14 = vpop.f32.mrb[8].mxu1 }
 0x1d4   :  { %841 = vst [vmem:[%s1460_s2 + $0x10] sm:$0xff] %v747_v14  ;;  %v810_v21 = vpop.f32.mrb[4].mxu0  ;;  %v749_v11 = vpop.f32.mrb[9].mxu1 }
 0x1d5   :  { %893 = vst [vmem:[%s1460_s2 + $0x98] sm:$0xff] %v810_v21  ;;  %892 = vst [vmem:[%s1460_s2 + $0x90] sm:$0xff] %v749_v11  ;;  %v812_v23 = vpop.f32.mrb[5].mxu0  ;;  %v751_v24 = vpop.f32.mrb[10].mxu1 }
 0x1d6   :  { %894 = vst [vmem:[%s1460_s2 + $0xa0] sm:$0xff] %v812_v23  ;;  %844 = vst [vmem:[%s1460_s2 + $0x28] sm:$0xff] %v751_v24  ;;  %v814_v1 = vpop.f32.mrb[6].mxu0  ;;  %v753_v52 = vpop.f32.mrb[11].mxu1 }
 0x1d7   :  { %896 = vst [vmem:[%s1460_s2 + $0xb0] sm:$0xff] %v814_v1  ;;  %895 = vst [vmem:[%s1460_s2 + $0xa8] sm:$0xff] %v753_v52  ;;  %v816_v15 = vpop.f32.mrb[7].mxu0 }
 0x1d8   :  { %897 = vst [vmem:[%s1460_s2 + $0xb8] sm:$0xff] %v816_v15 }
 0x1db   :  { %v757_v25 = vpop.f32.mrb[12].mxu1 }
 0x1dc   :  { %847 = vst [vmem:[%s1460_s2 + $0x40] sm:$0xff] %v757_v25  ;;  %v820_v8 = vpop.f32.mrb[8].mxu0  ;;  %v759_v17 = vpop.f32.mrb[13].mxu1 }
 0x1dd   :  { %899 = vst [vmem:[%s1460_s2 + $0xc8] sm:$0xff] %v820_v8  ;;  %898 = vst [vmem:[%s1460_s2 + $0xc0] sm:$0xff] %v759_v17  ;;  %v822_v30 = vpop.f32.mrb[9].mxu0  ;;  %v761_v32 = vpop.f32.mrb[14].mxu1 }
 0x1de   :  { %900 = vst [vmem:[%s1460_s2 + $0xd0] sm:$0xff] %v822_v30  ;;  %850 = vst [vmem:[%s1460_s2 + $0x58] sm:$0xff] %v761_v32  ;;  %v824_v33 = vpop.f32.mrb[10].mxu0  ;;  %v763_v45 = vpop.f32.mrb[15].mxu1 }
 0x1df   :  { %902 = vst [vmem:[%s1460_s2 + $0xe0] sm:$0xff] %v824_v33  ;;  %901 = vst [vmem:[%s1460_s2 + $0xd8] sm:$0xff] %v763_v45  ;;  %v826_v9 = vpop.f32.mrb[11].mxu0 }
 0x1e0   :  { %903 = vst [vmem:[%s1460_s2 + $0xe8] sm:$0xff] %v826_v9 }
 0x1e3   :  { %v767_v34 = vpop.f32.mrb[16].mxu1 }
 0x1e4   :  { %853 = vst [vmem:[%s1460_s2 + $0x70] sm:$0xff] %v767_v34  ;;  %v830_v22 = vpop.f32.mrb[12].mxu0  ;;  %v769_v31 = vpop.f32.mrb[17].mxu1 }
 0x1e5   :  { %905 = vst [vmem:[%s1460_s2 + $0xf8] sm:$0xff] %v830_v22  ;;  %904 = vst [vmem:[%s1460_s2 + $0xf0] sm:$0xff] %v769_v31  ;;  %v832_v38 = vpop.f32.mrb[13].mxu0  ;;  %v771_v39 = vpop.f32.mrb[18].mxu1 }
 0x1e6   :  { %906 = vst [vmem:[%s1460_s2 + $0x100] sm:$0xff] %v832_v38  ;;  %856 = vst [vmem:[%s1460_s2 + $0x88] sm:$0xff] %v771_v39  ;;  %v834_v41 = vpop.f32.mrb[14].mxu0  ;;  %v773_v35 = vpop.f32.mrb[19].mxu1 }
 0x1e7   :  { %908 = vst [vmem:[%s1460_s2 + $0x110] sm:$0xff] %v834_v41  ;;  %907 = vst [vmem:[%s1460_s2 + $0x108] sm:$0xff] %v773_v35  ;;  %v836_v19 = vpop.f32.mrb[15].mxu0 }
 0x1e8   :  { %909 = vst [vmem:[%s1460_s2 + $0x118] sm:$0xff] %v836_v19 }

</bundles_post_ra>
